<compile_context>
chip_gen: v7x
topology: tpu7x:2x2x1
jax: 0.10.0
libtpu: 0.0.40
codegen_flags: <defaults>
</compile_context>

<pallas_src>
import jax
import jax.numpy as jnp
from jax.experimental import pallas as pl
from jax.experimental.pallas import tpu as pltpu

_LANE = 128     # lane width: embedding dim padded to this
_TILE = 128     # row / contraction tile (128 also suits v5e's 128-wide MXU)


def _round_up(x, m):
    return (x + m - 1) // m * m


def _layer_kernel(adj_ref, cur_ref, acc_in_ref, nxt_ref, acc_out_ref, acc_scratch):
    """One LightGCN propagation layer for one row-tile.

    grid = (row tiles, contraction tiles); the contraction axis is last and
    marked 'arbitrary'. acc_scratch holds the f32 partial of adj_tile @ cur.
    """
    k = pl.program_id(1)

    @pl.when(k == 0)
    def _():
        acc_scratch[...] = jnp.zeros_like(acc_scratch)

    # bf16 x bf16 -> f32 accumulate on the MXU.
    acc_scratch[...] += jnp.dot(adj_ref[...], cur_ref[...],
                                preferred_element_type=jnp.float32)

    @pl.when(k == pl.num_programs(1) - 1)
    def _():
        nxt = acc_scratch[...]
        nxt_ref[...] = nxt.astype(nxt_ref.dtype)        # next-layer input (bf16)
        acc_out_ref[...] = acc_in_ref[...] + nxt        # running layer sum (f32)


def _make_layer_call(n_pad, d_pad):
    tm = min(_TILE, n_pad)
    tk = min(_TILE, n_pad)
    grid = (n_pad // tm, n_pad // tk)

    bytes_accessed = (n_pad * n_pad * 2          # adj (bf16)
                      + n_pad * d_pad * 2        # cur in (bf16)
                      + n_pad * d_pad * 4        # acc in (f32)
                      + n_pad * d_pad * 2        # nxt out (bf16)
                      + n_pad * d_pad * 4)       # acc out (f32)

    return pl.pallas_call(
        _layer_kernel,
        out_shape=(
            jax.ShapeDtypeStruct((n_pad, d_pad), jnp.bfloat16),   # next layer
            jax.ShapeDtypeStruct((n_pad, d_pad), jnp.float32),    # layer sum
        ),
        grid_spec=pltpu.PrefetchScalarGridSpec(
            num_scalar_prefetch=0,
            grid=grid,
            in_specs=[
                pl.BlockSpec((tm, tk), lambda i, k: (i, k)),        # adj tile
                pl.BlockSpec((tk, d_pad), lambda i, k: (k, 0)),     # cur rows
                pl.BlockSpec((tm, d_pad), lambda i, k: (i, 0)),     # acc-in rows
            ],
            out_specs=[
                pl.BlockSpec((tm, d_pad), lambda i, k: (i, 0)),     # nxt rows
                pl.BlockSpec((tm, d_pad), lambda i, k: (i, 0)),     # acc-out rows
            ],
            scratch_shapes=[pltpu.VMEM((tm, d_pad), jnp.float32)],
        ),
        compiler_params=pltpu.CompilerParams(
            dimension_semantics=("parallel", "arbitrary"),
            vmem_limit_bytes=32 * 1024 * 1024,   # explicit budget; fits v5e/v6e/v7x
        ),
        cost_estimate=pl.CostEstimate(
            flops=2 * n_pad * n_pad * d_pad,
            transcendentals=0,
            bytes_accessed=bytes_accessed,
        ),
        input_output_aliases={2: 1},   # acc_in buffer reused in-place for acc_out
    )


def _normalized_dense_adjacency(edge_index, num_nodes, n_pad):
    """Self loops + symmetric normalization, densified (zero-padded to n_pad)."""
    self_loops = jnp.arange(num_nodes, dtype=edge_index.dtype)
    row = jnp.concatenate([edge_index[0], self_loops])
    col = jnp.concatenate([edge_index[1], self_loops])

    deg = jnp.zeros((num_nodes,), dtype=jnp.float32).at[col].add(1.0)
    deg_inv_sqrt = jnp.power(deg, -0.5)
    deg_inv_sqrt = jnp.where(jnp.isinf(deg_inv_sqrt), 0.0, deg_inv_sqrt)
    norm = deg_inv_sqrt[row] * deg_inv_sqrt[col]

    # duplicates summed, matching torch.sparse_coo_tensor coalescing under spmm
    # TODO(synk): for large real (sparse) graphs, skip this O(N^2) densification
    # and gather neighbor rows with a PrefetchScalarGridSpec / manual-DMA CSR kernel.
    adj = jnp.zeros((n_pad, n_pad), dtype=jnp.float32).at[row, col].add(norm)
    return adj


def lightgcn_forward(edge_index, embedding_weight, num_nodes, num_layers):
    """Reproduces LightGCN.forward(edge_index).

    edge_index: (2, E) int32; embedding_weight: (num_nodes, D) f32
    returns: (num_nodes, D) f32 mean-over-layers embeddings.
    """
    n, d = embedding_weight.shape
    n_pad = _round_up(max(n, _TILE), _TILE)
    d_pad = _round_up(max(d, _LANE), _LANE)

    adj_bf16 = _normalized_dense_adjacency(edge_index, num_nodes, n_pad
                                           ).astype(jnp.bfloat16)

    emb = jnp.zeros((n_pad, d_pad), jnp.float32).at[:n, :d].set(
        embedding_weight.astype(jnp.float32))

    layer_call = _make_layer_call(n_pad, d_pad)

    acc = emb                               # layer-0 term of the mean (f32)
    cur = emb.astype(jnp.bfloat16)
    for _ in range(num_layers):             # layer loop hoisted out of the tile body
        cur, acc = layer_call(adj_bf16, cur, acc)

    # final mean; padded rows/cols are exactly zero, slice them away
    return acc[:n, :d] * (1.0 / float(num_layers + 1))


# ---------------- pure-JAX references for correctness checks ----------------

def lightgcn_reference_f32(edge_index, embedding_weight, num_nodes, num_layers):
    """Torch-semantics reference: f32 spmm, mean over layer stack."""
    adj = _normalized_dense_adjacency(edge_index, num_nodes, num_nodes)
    embs = [embedding_weight.astype(jnp.float32)]
    for _ in range(num_layers):
        embs.append(jnp.dot(adj, embs[-1], precision=jax.lax.Precision.HIGHEST))
    return jnp.mean(jnp.stack(embs, axis=1), axis=1)


def lightgcn_reference_bf16(edge_index, embedding_weight, num_nodes, num_layers):
    """Numerics-matched reference (bf16 operands, f32 accumulation)."""
    adj = _normalized_dense_adjacency(edge_index, num_nodes, num_nodes
                                      ).astype(jnp.bfloat16)
    acc = embedding_weight.astype(jnp.float32)
    cur = acc.astype(jnp.bfloat16)
    for _ in range(num_layers):
        nxt = jnp.dot(adj, cur, preferred_element_type=jnp.float32)
        acc = acc + nxt
        cur = nxt.astype(jnp.bfloat16)
    return acc * (1.0 / float(num_layers + 1))


if __name__ == "__main__":
    NUM_NODES = 64
    EMBEDDING_DIM = 32
    NUM_LAYERS = 3
    NUM_EDGES = 256

    key = jax.random.PRNGKey(0)
    k_emb, k_src, k_dst = jax.random.split(key, 3)

    # deterministic xavier_uniform_ init of nn.Embedding(num_nodes, embedding_dim)
    bound = (6.0 / (NUM_NODES + EMBEDDING_DIM)) ** 0.5
    embedding_weight = jax.random.uniform(
        k_emb, (NUM_NODES, EMBEDDING_DIM), dtype=jnp.float32,
        minval=-bound, maxval=bound)

    # synthetic heterogeneous edge_index (2, num_edges), int32 node ids
    src = jax.random.randint(k_src, (NUM_EDGES,), 0, NUM_NODES, dtype=jnp.int32)
    dst = jax.random.randint(k_dst, (NUM_EDGES,), 0, NUM_NODES, dtype=jnp.int32)
    edge_index = jnp.stack([src, dst], axis=0)

    fwd = jax.jit(lightgcn_forward, static_argnums=(2, 3))
    out = jax.block_until_ready(fwd(edge_index, embedding_weight,
                                    NUM_NODES, NUM_LAYERS))
    assert out.shape == (NUM_NODES, EMBEDDING_DIM)

    # tight check against the numerics-matched (bf16 operand / f32 acc) reference
    ref_bf16 = lightgcn_reference_bf16(edge_index, embedding_weight,
                                       NUM_NODES, NUM_LAYERS)
    assert jnp.allclose(out, ref_bf16, atol=1e-4, rtol=1e-4), \
        float(jnp.max(jnp.abs(out - ref_bf16)))

    # semantic check against the f32 torch-style reference (bf16-operand tolerance)
    ref_f32 = lightgcn_reference_f32(edge_index, embedding_weight,
                                     NUM_NODES, NUM_LAYERS)
    assert jnp.allclose(out, ref_f32, atol=2e-2, rtol=2e-2), \
        float(jnp.max(jnp.abs(out - ref_f32)))

    print("KERNEL_OK")
</pallas_src>

<mosaic_0001>
module attributes {stable_mosaic.version = 11 : i64} {
  func.func private @main(%arg0: i32) attributes {dimension_semantics = [#tpu.dimension_semantics<core_parallel>], iteration_bounds = array<i64: 2>, tpu.core_type = #tpu.core_type<sc_scalar_subcore>, window_params = []} {
    return
  }
}

module attributes {stable_mosaic.version = 11 : i64} {
  func.func private @main(%arg0: i32) attributes {dimension_semantics = [#tpu.dimension_semantics<core_parallel>], iteration_bounds = array<i64: 2>, tpu.core_type = #tpu.core_type<sc_scalar_subcore>, window_params = []} {
    return
  }
}

module attributes {stable_mosaic.version = 11 : i64} {
  func.func @_layer_kernel(%arg0: i32, %arg1: i32, %arg2: memref<128x128xbf16, #tpu.memory_space<vmem>>, %arg3: memref<128x128xbf16, #tpu.memory_space<vmem>>, %arg4: memref<128x128xf32, #tpu.memory_space<vmem>>, %arg5: memref<128x128xbf16, #tpu.memory_space<vmem>>, %arg6: memref<128x128xf32, #tpu.memory_space<vmem>>, %arg7: memref<128x128xf32, #tpu.memory_space<vmem>>) attributes {dimension_semantics = [#tpu.dimension_semantics<parallel>, #tpu.dimension_semantics<arbitrary>], iteration_bounds = array<i64: 1, 1>, scalar_prefetch = 0 : i64, scratch_operands = 1 : i64, tpu.core_type = #tpu.core_type<tc>, window_params = [{transform_indices = @transform_0, window_bounds = array<i64: 128, 128>}, {transform_indices = @transform_1, window_bounds = array<i64: 128, 128>}, {transform_indices = @transform_2, window_bounds = array<i64: 128, 128>}, {transform_indices = @transform_3, window_bounds = array<i64: 128, 128>}, {transform_indices = @transform_4, window_bounds = array<i64: 128, 128>}]} {
    %c0_i32 = arith.constant 0 : i32
    %0 = arith.cmpi eq, %arg1, %c0_i32 : i32
    %1 = arith.extui %0 : i1 to i32
    %c0_i32_0 = arith.constant 0 : i32
    %2 = arith.cmpi ne, %1, %c0_i32_0 : i32
    scf.if %2 {
      %cst_10 = arith.constant 0.000000e+00 : f32
      %12 = vector.broadcast %cst_10 : f32 to vector<128x128xf32>
      %c0_11 = arith.constant 0 : index
      %c0_12 = arith.constant 0 : index
      %13 = vector.load %arg7[%c0_11, %c0_12] : memref<128x128xf32, #tpu.memory_space<vmem>>, vector<128x128xf32>
      tpu.vector_store %arg7[%c0_11, %c0_12], %12 {strides = array<i32>} : memref<128x128xf32, #tpu.memory_space<vmem>>, vector<128x128xf32>,
    } else {
    }
    %c0 = arith.constant 0 : index
    %c0_1 = arith.constant 0 : index
    %3 = vector.load %arg7[%c0, %c0_1] : memref<128x128xf32, #tpu.memory_space<vmem>>, vector<128x128xf32>
    %c0_2 = arith.constant 0 : index
    %c0_3 = arith.constant 0 : index
    %4 = vector.load %arg2[%c0_2, %c0_3] : memref<128x128xbf16, #tpu.memory_space<vmem>>, vector<128x128xbf16>
    %c0_4 = arith.constant 0 : index
    %c0_5 = arith.constant 0 : index
    %5 = vector.load %arg3[%c0_4, %c0_5] : memref<128x128xbf16, #tpu.memory_space<vmem>>, vector<128x128xbf16>
    %cst = arith.constant dense<0.000000e+00> : vector<128x128xf32>
    %6 = tpu.matmul %4, %5, %cst {dimension_numbers = #tpu.dot_dimension_numbers<[1], [0], [0], [1], [0, 0, 1, 1], [], []>} : vector<128x128xbf16>, vector<128x128xbf16>, vector<128x128xf32> -> vector<128x128xf32>
    %7 = arith.addf %3, %6 : vector<128x128xf32>
    %c0_6 = arith.constant 0 : index
    %c0_7 = arith.constant 0 : index
    %8 = vector.load %arg7[%c0_6, %c0_7] : memref<128x128xf32, #tpu.memory_space<vmem>>, vector<128x128xf32>
    tpu.vector_store %arg7[%c0_6, %c0_7], %7 {strides = array<i32>} : memref<128x128xf32, #tpu.memory_space<vmem>>, vector<128x128xf32>,
    %c0_i32_8 = arith.constant 0 : i32
    %9 = arith.cmpi eq, %arg1, %c0_i32_8 : i32
    %10 = arith.extui %9 : i1 to i32
    %c0_i32_9 = arith.constant 0 : i32
    %11 = arith.cmpi ne, %10, %c0_i32_9 : i32
    scf.if %11 {
      %c0_10 = arith.constant 0 : index
      %c0_11 = arith.constant 0 : index
      %12 = vector.load %arg7[%c0_10, %c0_11] : memref<128x128xf32, #tpu.memory_space<vmem>>, vector<128x128xf32>
      %13 = arith.truncf %12 : vector<128x128xf32> to vector<128x128xbf16>
      %c0_12 = arith.constant 0 : index
      %c0_13 = arith.constant 0 : index
      %14 = vector.load %arg5[%c0_12, %c0_13] : memref<128x128xbf16, #tpu.memory_space<vmem>>, vector<128x128xbf16>
      tpu.vector_store %arg5[%c0_12, %c0_13], %13 {strides = array<i32>} : memref<128x128xbf16, #tpu.memory_space<vmem>>, vector<128x128xbf16>,
      %c0_14 = arith.constant 0 : index
      %c0_15 = arith.constant 0 : index
      %15 = vector.load %arg4[%c0_14, %c0_15] : memref<128x128xf32, #tpu.memory_space<vmem>>, vector<128x128xf32>
      %16 = arith.addf %15, %12 : vector<128x128xf32>
      %c0_16 = arith.constant 0 : index
      %c0_17 = arith.constant 0 : index
      %17 = vector.load %arg6[%c0_16, %c0_17] : memref<128x128xf32, #tpu.memory_space<vmem>>, vector<128x128xf32>
      tpu.vector_store %arg6[%c0_16, %c0_17], %16 {strides = array<i32>} : memref<128x128xf32, #tpu.memory_space<vmem>>, vector<128x128xf32>,
    } else {
    }
    return
  }
  func.func @transform_0(%arg0: i32, %arg1: i32) -> (i32, i32) {
    %c0_i32 = arith.constant 0 : i32
    return %arg0, %arg1 : i32, i32
  }
  func.func @transform_1(%arg0: i32, %arg1: i32) -> (i32, i32) {
    %c0_i32 = arith.constant 0 : i32
    %c0_i32_0 = arith.constant 0 : i32
    return %arg1, %c0_i32 : i32, i32
  }
  func.func @transform_2(%arg0: i32, %arg1: i32) -> (i32, i32) {
    %c0_i32 = arith.constant 0 : i32
    %c0_i32_0 = arith.constant 0 : i32
    return %arg0, %c0_i32 : i32, i32
  }
  func.func @transform_3(%arg0: i32, %arg1: i32) -> (i32, i32) {
    %c0_i32 = arith.constant 0 : i32
    %c0_i32_0 = arith.constant 0 : i32
    return %arg0, %c0_i32 : i32, i32
  }
  func.func @transform_4(%arg0: i32, %arg1: i32) -> (i32, i32) {
    %c0_i32 = arith.constant 0 : i32
    %c0_i32_0 = arith.constant 0 : i32
    return %arg0, %c0_i32 : i32, i32
  }
}

module attributes {stable_mosaic.version = 11 : i64} {
  func.func @_layer_kernel(%arg0: i32, %arg1: i32, %arg2: memref<128x128xbf16, #tpu.memory_space<vmem>>, %arg3: memref<128x128xbf16, #tpu.memory_space<vmem>>, %arg4: memref<128x128xf32, #tpu.memory_space<vmem>>, %arg5: memref<128x128xbf16, #tpu.memory_space<vmem>>, %arg6: memref<128x128xf32, #tpu.memory_space<vmem>>, %arg7: memref<128x128xf32, #tpu.memory_space<vmem>>) attributes {dimension_semantics = [#tpu.dimension_semantics<parallel>, #tpu.dimension_semantics<arbitrary>], iteration_bounds = array<i64: 1, 1>, scalar_prefetch = 0 : i64, scratch_operands = 1 : i64, tpu.core_type = #tpu.core_type<tc>, window_params = [{transform_indices = @transform_0, window_bounds = array<i64: 128, 128>}, {transform_indices = @transform_1, window_bounds = array<i64: 128, 128>}, {transform_indices = @transform_2, window_bounds = array<i64: 128, 128>}, {transform_indices = @transform_3, window_bounds = array<i64: 128, 128>}, {transform_indices = @transform_4, window_bounds = array<i64: 128, 128>}]} {
    %c0_i32 = arith.constant 0 : i32
    %0 = arith.cmpi eq, %arg1, %c0_i32 : i32
    %1 = arith.extui %0 : i1 to i32
    %c0_i32_0 = arith.constant 0 : i32
    %2 = arith.cmpi ne, %1, %c0_i32_0 : i32
    scf.if %2 {
      %cst_10 = arith.constant 0.000000e+00 : f32
      %12 = vector.broadcast %cst_10 : f32 to vector<128x128xf32>
      %c0_11 = arith.constant 0 : index
      %c0_12 = arith.constant 0 : index
      %13 = vector.load %arg7[%c0_11, %c0_12] : memref<128x128xf32, #tpu.memory_space<vmem>>, vector<128x128xf32>
      tpu.vector_store %arg7[%c0_11, %c0_12], %12 {strides = array<i32>} : memref<128x128xf32, #tpu.memory_space<vmem>>, vector<128x128xf32>,
    } else {
    }
    %c0 = arith.constant 0 : index
    %c0_1 = arith.constant 0 : index
    %3 = vector.load %arg7[%c0, %c0_1] : memref<128x128xf32, #tpu.memory_space<vmem>>, vector<128x128xf32>
    %c0_2 = arith.constant 0 : index
    %c0_3 = arith.constant 0 : index
    %4 = vector.load %arg2[%c0_2, %c0_3] : memref<128x128xbf16, #tpu.memory_space<vmem>>, vector<128x128xbf16>
    %c0_4 = arith.constant 0 : index
    %c0_5 = arith.constant 0 : index
    %5 = vector.load %arg3[%c0_4, %c0_5] : memref<128x128xbf16, #tpu.memory_space<vmem>>, vector<128x128xbf16>
    %cst = arith.constant dense<0.000000e+00> : vector<128x128xf32>
    %6 = tpu.matmul %4, %5, %cst {dimension_numbers = #tpu.dot_dimension_numbers<[1], [0], [0], [1], [0, 0, 1, 1], [], []>} : vector<128x128xbf16>, vector<128x128xbf16>, vector<128x128xf32> -> vector<128x128xf32>
    %7 = arith.addf %3, %6 : vector<128x128xf32>
    %c0_6 = arith.constant 0 : index
    %c0_7 = arith.constant 0 : index
    %8 = vector.load %arg7[%c0_6, %c0_7] : memref<128x128xf32, #tpu.memory_space<vmem>>, vector<128x128xf32>
    tpu.vector_store %arg7[%c0_6, %c0_7], %7 {strides = array<i32>} : memref<128x128xf32, #tpu.memory_space<vmem>>, vector<128x128xf32>,
    %c0_i32_8 = arith.constant 0 : i32
    %9 = arith.cmpi eq, %arg1, %c0_i32_8 : i32
    %10 = arith.extui %9 : i1 to i32
    %c0_i32_9 = arith.constant 0 : i32
    %11 = arith.cmpi ne, %10, %c0_i32_9 : i32
    scf.if %11 {
      %c0_10 = arith.constant 0 : index
      %c0_11 = arith.constant 0 : index
      %12 = vector.load %arg7[%c0_10, %c0_11] : memref<128x128xf32, #tpu.memory_space<vmem>>, vector<128x128xf32>
      %13 = arith.truncf %12 : vector<128x128xf32> to vector<128x128xbf16>
      %c0_12 = arith.constant 0 : index
      %c0_13 = arith.constant 0 : index
      %14 = vector.load %arg5[%c0_12, %c0_13] : memref<128x128xbf16, #tpu.memory_space<vmem>>, vector<128x128xbf16>
      tpu.vector_store %arg5[%c0_12, %c0_13], %13 {strides = array<i32>} : memref<128x128xbf16, #tpu.memory_space<vmem>>, vector<128x128xbf16>,
      %c0_14 = arith.constant 0 : index
      %c0_15 = arith.constant 0 : index
      %15 = vector.load %arg4[%c0_14, %c0_15] : memref<128x128xf32, #tpu.memory_space<vmem>>, vector<128x128xf32>
      %16 = arith.addf %15, %12 : vector<128x128xf32>
      %c0_16 = arith.constant 0 : index
      %c0_17 = arith.constant 0 : index
      %17 = vector.load %arg6[%c0_16, %c0_17] : memref<128x128xf32, #tpu.memory_space<vmem>>, vector<128x128xf32>
      tpu.vector_store %arg6[%c0_16, %c0_17], %16 {strides = array<i32>} : memref<128x128xf32, #tpu.memory_space<vmem>>, vector<128x128xf32>,
    } else {
    }
    return
  }
  func.func @transform_0(%arg0: i32, %arg1: i32) -> (i32, i32) {
    %c0_i32 = arith.constant 0 : i32
    return %arg0, %arg1 : i32, i32
  }
  func.func @transform_1(%arg0: i32, %arg1: i32) -> (i32, i32) {
    %c0_i32 = arith.constant 0 : i32
    %c0_i32_0 = arith.constant 0 : i32
    return %arg1, %c0_i32 : i32, i32
  }
  func.func @transform_2(%arg0: i32, %arg1: i32) -> (i32, i32) {
    %c0_i32 = arith.constant 0 : i32
    %c0_i32_0 = arith.constant 0 : i32
    return %arg0, %c0_i32 : i32, i32
  }
  func.func @transform_3(%arg0: i32, %arg1: i32) -> (i32, i32) {
    %c0_i32 = arith.constant 0 : i32
    %c0_i32_0 = arith.constant 0 : i32
    return %arg0, %c0_i32 : i32, i32
  }
  func.func @transform_4(%arg0: i32, %arg1: i32) -> (i32, i32) {
    %c0_i32 = arith.constant 0 : i32
    %c0_i32_0 = arith.constant 0 : i32
    return %arg0, %c0_i32 : i32, i32
  }
}

</mosaic_0001>

<bundles_post_ra>
// kernel: lightgcn_forward.5
= control target key start
LH: loop header
LB: loop body
LE: loop exit
PB: predicated region body
PF: predicated region fallthrough
CT: control target
= control target key end

     0   :  { %s871_s0 = inlined_call_operand.vmem [shape: bf16[128,128], index: 0, kind: input, shape index: {}]   ;;  %s872_s1 = inlined_call_operand.vmem [shape: bf16[128,128], index: 1, kind: input, shape index: {}]   ;;  %s873_s2 = inlined_call_operand.vmem [shape: f32[128,128], index: 2, kind: input, shape index: {}, may-alias: {2,4}]   ;;  %s874_s3 = inlined_call_operand.hbm [shape: bf16[128,128], index: 3, kind: output, shape index: {0}]   ;;  %s875_s4 = inlined_call_operand.vmem [shape: f32[128,128], index: 4, kind: output, shape index: {1}, may-alias: {2,4}]  }
   0x1   :  { %v640_v0 = vld [vmem:[%s872_s1] sm:$0xff]   ;;  %v641_v1 = vld [vmem:[%s872_s1 + $0x8] sm:$0xff]   ;;  %v642_v2 = vld [vmem:[%s872_s1 + $0x10] sm:$0xff]  }
   0x2   :  { %589 = vmatprep.subr.bf16.mxu0 %v640_v0  ;;  %621 = vmatprep.subr.bf16.mxu1 %v640_v0  ;;  %v643_v3 = vld [vmem:[%s872_s1 + $0x18] sm:$0xff]   ;;  %v648_v4 = vld [vmem:[%s871_s0] sm:$0xff]   ;;  %v645_v7 = vld [vmem:[%s872_s1 + $0x28] sm:$0xff]  }
   0x3   :  { %590 = vmatpush3.bf16.msra.mxu0 %v640_v0  ;;  %629 = vmatpush3.bf16.msra.mxu1 %v640_v0  ;;  %v649_v5 = vld [vmem:[%s871_s0 + $0x20] sm:$0xff]  }
   0x4   :  { %591 = vmatprep.subr.bf16.mxu0 %v641_v1  ;;  %622 = vmatprep.subr.bf16.mxu1 %v641_v1  ;;  %v644_v6 = vld [vmem:[%s872_s1 + $0x20] sm:$0xff]  }
   0x5   :  { %605 = vmatprep.mubr.bf16.mxu0 %v648_v4  ;;  %613 = vmatprep.mubr.bf16.mxu1 %v649_v5 }
   0x7   :  { %592 = vmatpush3.bf16.msra.mxu0 %v641_v1  ;;  %630 = vmatpush3.bf16.msra.mxu1 %v641_v1 }
   0x8   :  { %593 = vmatprep.subr.bf16.mxu0 %v642_v2  ;;  %623 = vmatprep.subr.bf16.mxu1 %v642_v2 }
   0xb   :  { %594 = vmatpush3.bf16.msra.mxu0 %v642_v2  ;;  %631 = vmatpush3.bf16.msra.mxu1 %v642_v2 }
   0xc   :  { %595 = vmatprep.subr.bf16.mxu0 %v643_v3  ;;  %624 = vmatprep.subr.bf16.mxu1 %v643_v3 }
   0xf   :  { %596 = vmatpush3.bf16.msra.mxu0 %v643_v3  ;;  %632 = vmatpush3.bf16.msra.mxu1 %v643_v3 }
  0x10   :  { %597 = vmatprep.subr.bf16.mxu0 %v644_v6  ;;  %625 = vmatprep.subr.bf16.mxu1 %v644_v6 }
  0x11   :  { %10 = vsyncpa [#allocation4], 0  ;;  %v646_v8 = vld [vmem:[%s872_s1 + $0x30] sm:$0xff]   ;;  %v647_v9 = vld [vmem:[%s872_s1 + $0x38] sm:$0xff]   ;;  %s680_s9 = smov [#allocation3]  }
  0x12   :  { %v650_v10 = vld [vmem:[%s871_s0 + $0x8] sm:$0xff]   ;;  %v652_v12 = vld [vmem:[%s871_s0 + $0x10] sm:$0xff]   ;;  %v654_v14 = vld [vmem:[%s871_s0 + $0x18] sm:$0xff]   ;;  %s463_s10 = sshll.u32 %s680_s9, 4  ;;  %s834_s10 = int_to_ptr.vmem [resolvable:$true] %s463_s10 }
  0x13   :  { %598 = vmatpush3.bf16.msra.mxu0 %v644_v6  ;;  %633 = vmatpush3.bf16.msra.mxu1 %v644_v6  ;;  %v651_v11 = vld [vmem:[%s871_s0 + $0x28] sm:$0xff]   ;;  %v653_v13 = vld [vmem:[%s871_s0 + $0x30] sm:$0xff]   ;;  %v655_v15 = vld [vmem:[%s871_s0 + $0x38] sm:$0xff]   ;;  %s656_s28 = scalar_lea.vmem %s834_s10, 1024  ;;  %p661_p1 = scmp.lt.s32.totalorder %s834_s10, %s834_s10 }
  0x14   :  { %599 = vmatprep.subr.bf16.mxu0 %v645_v7  ;;  %626 = vmatprep.subr.bf16.mxu1 %v645_v7  ;;  %v412_v16 = vld [vmem:[%s873_s2 + $0x10] sm:$0xff]  ;;  %v410_v18 = vld [vmem:[%s873_s2] sm:$0xff]  ;;  %v413_v22 = vld [vmem:[%s873_s2 + $0x18] sm:$0xff]  ;;  %p657_p0 = scmp.ne.s32.totalorder %s834_s10, %s656_s28  ;;  %p662_p2 = scmp.lt.s32.totalorder %s656_s28, %s656_s28 }
  0x15   :  { %v420_v17 = vld [vmem:[%s873_s2 + $0x50] sm:$0xff]  ;;  %v418_v19 = vld [vmem:[%s873_s2 + $0x40] sm:$0xff]  ;;  %v421_v23 = vld [vmem:[%s873_s2 + $0x58] sm:$0xff] }
  0x16   :  { %v411_v28 = vld [vmem:[%s873_s2 + $0x8] sm:$0xff]  ;;  %p663_p3 = por %p662_p2, %p661_p1 }
  0x17   :  { %600 = vmatpush3.bf16.msra.mxu0 %v645_v7  ;;  %634 = vmatpush3.bf16.msra.mxu1 %v645_v7  ;;  %v419_v29 = vld [vmem:[%s873_s2 + $0x48] sm:$0xff] }
  0x18   :  { %601 = vmatprep.subr.bf16.mxu0 %v646_v8  ;;  %627 = vmatprep.subr.bf16.mxu1 %v646_v8  ;;  %p664_p4 = pnand %p663_p3, %p657_p0 }
  0x1b   :  { %602 = vmatpush3.bf16.msra.mxu0 %v646_v8  ;;  %635 = vmatpush3.bf16.msra.mxu1 %v646_v8 }
  0x1c   :  { %603 = vmatprep.subr.bf16.mxu0 %v647_v9  ;;  %628 = vmatprep.subr.bf16.mxu1 %v647_v9 }
  0x1f   :  { %604 = vmatpush3.bf16.msra.mxu0 %v647_v9  ;;  %636 = vmatpush3.bf16.msra.mxu1 %v647_v9 }
  0x22   :  { %606 = vmatmul.mubr.bf16.vlgmr.msra.gmra.mrb[0].mxu0 %v650_v10  ;;  %614 = vmatmul.mubr.bf16.vlgmr.msra.gmra.mrb[0].mxu1 %v651_v11 }
  0x23   :  { %609 = vmatprep.mubr.bf16.mxu0 %v652_v12  ;;  %617 = vmatprep.mubr.bf16.mxu1 %v653_v13 }
  0x2a   :  { %610 = vmatmul.mubr.bf16.gmra.mrb[4].mxu0 %v654_v14  ;;  %618 = vmatmul.mubr.bf16.gmra.mrb[4].mxu1 %v655_v15 }
  0xf5   :  { %v607_v20 = vpop.f32.mrb[0].mxu0  ;;  %v615_v21 = vpop.f32.mrb[0].mxu1 }
  0xf6   :  { %v428_v24 = vadd.f32 %v607_v20, %v412_v16  ;;  %v436_v25 = vadd.f32 %v615_v21, %v420_v17  ;;  %v216_v26 = vpop.f32.mrb[1].mxu0  ;;  %v248_v27 = vpop.f32.mrb[1].mxu1 }
  0xf7   :  { %v426_v30 = vadd.f32 %v410_v18, %v216_v26  ;;  %v434_v31 = vadd.f32 %v418_v19, %v248_v27  ;;  %v608_v32 = vpop.f32.mrb[2].mxu0  ;;  %v616_v33 = vpop.f32.mrb[2].mxu1 }
  0xf8   :  { %444 = vst [vmem:[%s875_s4 + $0x10] sm:$0xff] %v428_v24  ;;  %452 = vst [vmem:[%s875_s4 + $0x50] sm:$0xff] %v436_v25  ;;  %v534_v34 = vpack.c.bf16 %v608_v32, %v607_v20  ;;  %v429_v35 = vadd.f32 %v608_v32, %v413_v22  ;;  %v554_v36 = vpack.c.bf16 %v616_v33, %v615_v21  ;;  %v219_v38 = vpop.f32.mrb[3].mxu0  ;;  %v251_v39 = vpop.f32.mrb[3].mxu1 }
  0xf9   :  { %v437_v37 = vadd.f32 %v616_v33, %v421_v23  ;;  %442 = vst [vmem:[%s875_s4] sm:$0xff] %v426_v30  ;;  %450 = vst [vmem:[%s875_s4 + $0x40] sm:$0xff] %v434_v31  ;;  %v529_v40 = vpack.c.bf16 %v219_v38, %v216_v26  ;;  %v427_v41 = vadd.f32 %v411_v28, %v219_v38 }
  0xfa   :  { %v549_v42 = vpack.c.bf16 %v251_v39, %v248_v27  ;;  %v435_v43 = vadd.f32 %v419_v29, %v251_v39  ;;  %566 = vst [vmem:[#allocation3 + $0x8] sm:$0xff] %v534_v34   ;;  %445 = vst [vmem:[%s875_s4 + $0x18] sm:$0xff] %v429_v35 }
  0xfb   :  { %570 = vst [vmem:[#allocation3 + $0x28] sm:$0xff] %v554_v36   ;;  %453 = vst [vmem:[%s875_s4 + $0x58] sm:$0xff] %v437_v37 }
  0xfc   :  { %530 = vst [vmem:[#allocation3] sm:$0xff] %v529_v40   ;;  %443 = vst [vmem:[%s875_s4 + $0x8] sm:$0xff] %v427_v41 }
  0xfd   :  { %569 = vst [vmem:[#allocation3 + $0x20] sm:$0xff] %v549_v42   ;;  %451 = vst [vmem:[%s875_s4 + $0x48] sm:$0xff] %v435_v43  ;;  %v611_v48 = vpop.f32.mrb[4].mxu0  ;;  %v619_v49 = vpop.f32.mrb[4].mxu1 }
  0xfe   :  { %v232_v54 = vpop.f32.mrb[5].mxu0  ;;  %v264_v55 = vpop.f32.mrb[5].mxu1 }
  0xff   :  { %v612_v60 = vpop.f32.mrb[6].mxu0  ;;  %v620_v61 = vpop.f32.mrb[6].mxu1 }
 0x100   :  { %v544_v62 = vpack.c.bf16 %v612_v60, %v611_v48  ;;  %v564_v0 = vpack.c.bf16 %v620_v61, %v619_v49  ;;  %v235_v2 = vpop.f32.mrb[7].mxu0  ;;  %v267_v3 = vpop.f32.mrb[7].mxu1 }
 0x101   :  { %v539_v4 = vpack.c.bf16 %v235_v2, %v232_v54  ;;  %v559_v6 = vpack.c.bf16 %v267_v3, %v264_v55 }
 0x102   :  { %568 = vst [vmem:[#allocation3 + $0x18] sm:$0xff] %v544_v62   ;;  %572 = vst [vmem:[#allocation3 + $0x38] sm:$0xff] %v564_v0  }
 0x103   :  { %567 = vst [vmem:[#allocation3 + $0x10] sm:$0xff] %v539_v4   ;;  %571 = vst [vmem:[#allocation3 + $0x30] sm:$0xff] %v559_v6  }
 0x104   :  { %v416_v44 = vld [vmem:[%s873_s2 + $0x30] sm:$0xff]  ;;  %v414_v46 = vld [vmem:[%s873_s2 + $0x20] sm:$0xff]  ;;  %v417_v50 = vld [vmem:[%s873_s2 + $0x38] sm:$0xff] }
 0x105   :  { %v424_v45 = vld [vmem:[%s873_s2 + $0x70] sm:$0xff]  ;;  %v422_v47 = vld [vmem:[%s873_s2 + $0x60] sm:$0xff]  ;;  %v425_v51 = vld [vmem:[%s873_s2 + $0x78] sm:$0xff]  ;;  %v432_v52 = vadd.f32 %v611_v48, %v416_v44  ;;  %v430_v58 = vadd.f32 %v414_v46, %v232_v54  ;;  %v433_v63 = vadd.f32 %v612_v60, %v417_v50 }
 0x106   :  { %v440_v53 = vadd.f32 %v619_v49, %v424_v45  ;;  %v415_v56 = vld [vmem:[%s873_s2 + $0x28] sm:$0xff]  ;;  %v438_v59 = vadd.f32 %v422_v47, %v264_v55  ;;  %v441_v1 = vadd.f32 %v620_v61, %v425_v51 }
 0x107   :  { %v423_v57 = vld [vmem:[%s873_s2 + $0x68] sm:$0xff]  ;;  %v431_v5 = vadd.f32 %v415_v56, %v235_v2 }
 0x108   :  { %448 = vst [vmem:[%s875_s4 + $0x30] sm:$0xff] %v432_v52  ;;  %456 = vst [vmem:[%s875_s4 + $0x70] sm:$0xff] %v440_v53  ;;  %v439_v7 = vadd.f32 %v423_v57, %v267_v3 }
 0x109   :  { %446 = vst [vmem:[%s875_s4 + $0x20] sm:$0xff] %v430_v58  ;;  %454 = vst [vmem:[%s875_s4 + $0x60] sm:$0xff] %v438_v59 }
 0x10a   :  { %449 = vst [vmem:[%s875_s4 + $0x38] sm:$0xff] %v433_v63  ;;  %457 = vst [vmem:[%s875_s4 + $0x78] sm:$0xff] %v441_v1 }
 0x10b   :  { %447 = vst [vmem:[%s875_s4 + $0x28] sm:$0xff] %v431_v5  ;;  %455 = vst [vmem:[%s875_s4 + $0x68] sm:$0xff] %v439_v7 }
 0x10c   :  { %667 = shalt.err (!%p664_p4)
}
 0x10d   :  { %s668_s5 = scalar_lea.hbm %s874_s3, 1024 }
 0x10e   :  { %p669_p5 = scmp.ne.s32.totalorder %s874_s3, %s668_s5  ;;  %p672_p6 = scmp.lt.u32.totalorder %s668_s5, %s874_s3 }
 0x110   :  { %p674_p7 = pnand %p672_p6, %p669_p5 }
 0x112   :  { %677 = shalt.err (!%p674_p7)
}
 0x113   :  { %s681_s4 = smov 64   ;;  %s682_s11 = smov 4  }
 0x114   :  { %469 = dma.vmem_to_hbm [thread:$0]  %s834_s10, 1024, %s874_s3, [#allocation4], %s681_s4, %s681_s4, %s682_s11  }
 0x115   :  { %678 = dma.done.wait [#allocation4], 1024  }
 0x116   :  { %679 = vsyncadd [#allocation4], 4294966272 }
 0x117   :  { %477 = vsyncpa [#allocation4], 1 }

// kernel: lightgcn_forward.3
= control target key start
LH: loop header
LB: loop body
LE: loop exit
PB: predicated region body
PF: predicated region fallthrough
CT: control target
= control target key end

     0   :  { %s833_s1 = inlined_call_operand.vmem [shape: bf16[128,128], index: 1, kind: input, shape index: {}]   ;;  %s834_s0 = inlined_call_operand.vmem [shape: bf16[128,128], index: 0, kind: input, shape index: {}]   ;;  %s835_s2 = inlined_call_operand.vmem [shape: f32[128,128], index: 2, kind: input, shape index: {}, may-alias: {2,4}]   ;;  %s836_s4 = inlined_call_operand.vmem [shape: f32[128,128], index: 4, kind: output, shape index: {1}, may-alias: {2,4}]   ;;  %s837_s3 = inlined_call_operand.vmem [shape: bf16[128,128], index: 3, kind: output, shape index: {0}]  }
   0x1   :  { %v624_v0 = vld [vmem:[%s833_s1] sm:$0xff]   ;;  %v625_v1 = vld [vmem:[%s833_s1 + $0x8] sm:$0xff]   ;;  %v626_v2 = vld [vmem:[%s833_s1 + $0x10] sm:$0xff]  }
   0x2   :  { %576 = vmatprep.subr.bf16.mxu0 %v624_v0  ;;  %608 = vmatprep.subr.bf16.mxu1 %v624_v0  ;;  %v627_v3 = vld [vmem:[%s833_s1 + $0x18] sm:$0xff]   ;;  %v632_v4 = vld [vmem:[%s834_s0] sm:$0xff]   ;;  %v629_v7 = vld [vmem:[%s833_s1 + $0x28] sm:$0xff]  }
   0x3   :  { %577 = vmatpush3.bf16.msra.mxu0 %v624_v0  ;;  %616 = vmatpush3.bf16.msra.mxu1 %v624_v0  ;;  %v633_v5 = vld [vmem:[%s834_s0 + $0x20] sm:$0xff]   ;;  %v630_v8 = vld [vmem:[%s833_s1 + $0x30] sm:$0xff]   ;;  %v631_v9 = vld [vmem:[%s833_s1 + $0x38] sm:$0xff]  }
   0x4   :  { %578 = vmatprep.subr.bf16.mxu0 %v625_v1  ;;  %609 = vmatprep.subr.bf16.mxu1 %v625_v1  ;;  %v628_v6 = vld [vmem:[%s833_s1 + $0x20] sm:$0xff]   ;;  %v634_v10 = vld [vmem:[%s834_s0 + $0x8] sm:$0xff]   ;;  %v636_v12 = vld [vmem:[%s834_s0 + $0x10] sm:$0xff]  }
   0x5   :  { %592 = vmatprep.mubr.bf16.mxu0 %v632_v4  ;;  %600 = vmatprep.mubr.bf16.mxu1 %v633_v5  ;;  %v635_v11 = vld [vmem:[%s834_s0 + $0x28] sm:$0xff]   ;;  %v637_v13 = vld [vmem:[%s834_s0 + $0x30] sm:$0xff]   ;;  %v638_v14 = vld [vmem:[%s834_s0 + $0x18] sm:$0xff]  }
   0x6   :  { %v639_v15 = vld [vmem:[%s834_s0 + $0x38] sm:$0xff]   ;;  %v411_v16 = vld [vmem:[%s835_s2 + $0x10] sm:$0xff]  ;;  %v409_v18 = vld [vmem:[%s835_s2] sm:$0xff] }
   0x7   :  { %579 = vmatpush3.bf16.msra.mxu0 %v625_v1  ;;  %617 = vmatpush3.bf16.msra.mxu1 %v625_v1  ;;  %v419_v17 = vld [vmem:[%s835_s2 + $0x50] sm:$0xff]  ;;  %v417_v19 = vld [vmem:[%s835_s2 + $0x40] sm:$0xff]  ;;  %v412_v22 = vld [vmem:[%s835_s2 + $0x18] sm:$0xff] }
   0x8   :  { %580 = vmatprep.subr.bf16.mxu0 %v626_v2  ;;  %610 = vmatprep.subr.bf16.mxu1 %v626_v2  ;;  %v420_v23 = vld [vmem:[%s835_s2 + $0x58] sm:$0xff]  ;;  %v410_v28 = vld [vmem:[%s835_s2 + $0x8] sm:$0xff] }
   0x9   :  { %v418_v29 = vld [vmem:[%s835_s2 + $0x48] sm:$0xff] }
   0xb   :  { %581 = vmatpush3.bf16.msra.mxu0 %v626_v2  ;;  %618 = vmatpush3.bf16.msra.mxu1 %v626_v2 }
   0xc   :  { %582 = vmatprep.subr.bf16.mxu0 %v627_v3  ;;  %611 = vmatprep.subr.bf16.mxu1 %v627_v3 }
   0xf   :  { %583 = vmatpush3.bf16.msra.mxu0 %v627_v3  ;;  %619 = vmatpush3.bf16.msra.mxu1 %v627_v3 }
  0x10   :  { %584 = vmatprep.subr.bf16.mxu0 %v628_v6  ;;  %612 = vmatprep.subr.bf16.mxu1 %v628_v6 }
  0x13   :  { %585 = vmatpush3.bf16.msra.mxu0 %v628_v6  ;;  %620 = vmatpush3.bf16.msra.mxu1 %v628_v6 }
  0x14   :  { %586 = vmatprep.subr.bf16.mxu0 %v629_v7  ;;  %613 = vmatprep.subr.bf16.mxu1 %v629_v7 }
  0x17   :  { %587 = vmatpush3.bf16.msra.mxu0 %v629_v7  ;;  %621 = vmatpush3.bf16.msra.mxu1 %v629_v7 }
  0x18   :  { %588 = vmatprep.subr.bf16.mxu0 %v630_v8  ;;  %614 = vmatprep.subr.bf16.mxu1 %v630_v8 }
  0x1b   :  { %589 = vmatpush3.bf16.msra.mxu0 %v630_v8  ;;  %622 = vmatpush3.bf16.msra.mxu1 %v630_v8 }
  0x1c   :  { %590 = vmatprep.subr.bf16.mxu0 %v631_v9  ;;  %615 = vmatprep.subr.bf16.mxu1 %v631_v9 }
  0x1f   :  { %591 = vmatpush3.bf16.msra.mxu0 %v631_v9  ;;  %623 = vmatpush3.bf16.msra.mxu1 %v631_v9 }
  0x22   :  { %593 = vmatmul.mubr.bf16.vlgmr.msra.gmra.mrb[0].mxu0 %v634_v10  ;;  %601 = vmatmul.mubr.bf16.vlgmr.msra.gmra.mrb[0].mxu1 %v635_v11 }
  0x23   :  { %596 = vmatprep.mubr.bf16.mxu0 %v636_v12  ;;  %604 = vmatprep.mubr.bf16.mxu1 %v637_v13 }
  0x2a   :  { %597 = vmatmul.mubr.bf16.gmra.mrb[4].mxu0 %v638_v14  ;;  %605 = vmatmul.mubr.bf16.gmra.mrb[4].mxu1 %v639_v15 }
  0xf5   :  { %v594_v20 = vpop.f32.mrb[0].mxu0  ;;  %v602_v21 = vpop.f32.mrb[0].mxu1 }
  0xf6   :  { %v427_v24 = vadd.f32 %v594_v20, %v411_v16  ;;  %v435_v25 = vadd.f32 %v602_v21, %v419_v17  ;;  %v215_v26 = vpop.f32.mrb[1].mxu0  ;;  %v247_v27 = vpop.f32.mrb[1].mxu1 }
  0xf7   :  { %v425_v30 = vadd.f32 %v409_v18, %v215_v26  ;;  %v433_v31 = vadd.f32 %v417_v19, %v247_v27  ;;  %v595_v32 = vpop.f32.mrb[2].mxu0  ;;  %v603_v33 = vpop.f32.mrb[2].mxu1 }
  0xf8   :  { %443 = vst [vmem:[%s836_s4 + $0x10] sm:$0xff] %v427_v24  ;;  %451 = vst [vmem:[%s836_s4 + $0x50] sm:$0xff] %v435_v25  ;;  %v521_v34 = vpack.c.bf16 %v595_v32, %v594_v20  ;;  %v428_v35 = vadd.f32 %v595_v32, %v412_v22  ;;  %v541_v36 = vpack.c.bf16 %v603_v33, %v602_v21  ;;  %v218_v38 = vpop.f32.mrb[3].mxu0  ;;  %v250_v39 = vpop.f32.mrb[3].mxu1 }
  0xf9   :  { %v436_v37 = vadd.f32 %v603_v33, %v420_v23  ;;  %441 = vst [vmem:[%s836_s4] sm:$0xff] %v425_v30  ;;  %449 = vst [vmem:[%s836_s4 + $0x40] sm:$0xff] %v433_v31  ;;  %v516_v40 = vpack.c.bf16 %v218_v38, %v215_v26  ;;  %v426_v41 = vadd.f32 %v410_v28, %v218_v38 }
  0xfa   :  { %v536_v42 = vpack.c.bf16 %v250_v39, %v247_v27  ;;  %v434_v43 = vadd.f32 %v418_v29, %v250_v39  ;;  %553 = vst [vmem:[%s837_s3 + $0x8] sm:$0xff] %v521_v34   ;;  %444 = vst [vmem:[%s836_s4 + $0x18] sm:$0xff] %v428_v35 }
  0xfb   :  { %557 = vst [vmem:[%s837_s3 + $0x28] sm:$0xff] %v541_v36   ;;  %452 = vst [vmem:[%s836_s4 + $0x58] sm:$0xff] %v436_v37 }
  0xfc   :  { %517 = vst [vmem:[%s837_s3] sm:$0xff] %v516_v40   ;;  %442 = vst [vmem:[%s836_s4 + $0x8] sm:$0xff] %v426_v41 }
  0xfd   :  { %556 = vst [vmem:[%s837_s3 + $0x20] sm:$0xff] %v536_v42   ;;  %450 = vst [vmem:[%s836_s4 + $0x48] sm:$0xff] %v434_v43  ;;  %v598_v48 = vpop.f32.mrb[4].mxu0  ;;  %v606_v49 = vpop.f32.mrb[4].mxu1 }
  0xfe   :  { %v231_v54 = vpop.f32.mrb[5].mxu0  ;;  %v263_v55 = vpop.f32.mrb[5].mxu1 }
  0xff   :  { %v599_v60 = vpop.f32.mrb[6].mxu0  ;;  %v607_v61 = vpop.f32.mrb[6].mxu1 }
 0x100   :  { %v531_v62 = vpack.c.bf16 %v599_v60, %v598_v48  ;;  %v551_v0 = vpack.c.bf16 %v607_v61, %v606_v49  ;;  %v234_v2 = vpop.f32.mrb[7].mxu0  ;;  %v266_v3 = vpop.f32.mrb[7].mxu1 }
 0x101   :  { %v526_v4 = vpack.c.bf16 %v234_v2, %v231_v54  ;;  %v546_v6 = vpack.c.bf16 %v266_v3, %v263_v55 }
 0x102   :  { %555 = vst [vmem:[%s837_s3 + $0x18] sm:$0xff] %v531_v62   ;;  %559 = vst [vmem:[%s837_s3 + $0x38] sm:$0xff] %v551_v0  }
 0x103   :  { %554 = vst [vmem:[%s837_s3 + $0x10] sm:$0xff] %v526_v4   ;;  %558 = vst [vmem:[%s837_s3 + $0x30] sm:$0xff] %v546_v6  }
 0x104   :  { %v415_v44 = vld [vmem:[%s835_s2 + $0x30] sm:$0xff]  ;;  %v413_v46 = vld [vmem:[%s835_s2 + $0x20] sm:$0xff]  ;;  %v416_v50 = vld [vmem:[%s835_s2 + $0x38] sm:$0xff] }
 0x105   :  { %v423_v45 = vld [vmem:[%s835_s2 + $0x70] sm:$0xff]  ;;  %v421_v47 = vld [vmem:[%s835_s2 + $0x60] sm:$0xff]  ;;  %v424_v51 = vld [vmem:[%s835_s2 + $0x78] sm:$0xff]  ;;  %v431_v52 = vadd.f32 %v598_v48, %v415_v44  ;;  %v429_v58 = vadd.f32 %v413_v46, %v231_v54  ;;  %v432_v63 = vadd.f32 %v599_v60, %v416_v50 }
 0x106   :  { %v439_v53 = vadd.f32 %v606_v49, %v423_v45  ;;  %v414_v56 = vld [vmem:[%s835_s2 + $0x28] sm:$0xff]  ;;  %v437_v59 = vadd.f32 %v421_v47, %v263_v55  ;;  %v440_v1 = vadd.f32 %v607_v61, %v424_v51 }
 0x107   :  { %v422_v57 = vld [vmem:[%s835_s2 + $0x68] sm:$0xff]  ;;  %v430_v5 = vadd.f32 %v414_v56, %v234_v2 }
 0x108   :  { %447 = vst [vmem:[%s836_s4 + $0x30] sm:$0xff] %v431_v52  ;;  %455 = vst [vmem:[%s836_s4 + $0x70] sm:$0xff] %v439_v53  ;;  %v438_v7 = vadd.f32 %v422_v57, %v266_v3 }
 0x109   :  { %445 = vst [vmem:[%s836_s4 + $0x20] sm:$0xff] %v429_v58  ;;  %453 = vst [vmem:[%s836_s4 + $0x60] sm:$0xff] %v437_v59 }
 0x10a   :  { %448 = vst [vmem:[%s836_s4 + $0x38] sm:$0xff] %v432_v63  ;;  %456 = vst [vmem:[%s836_s4 + $0x78] sm:$0xff] %v440_v1 }
 0x10b   :  { %446 = vst [vmem:[%s836_s4 + $0x28] sm:$0xff] %v430_v5  ;;  %454 = vst [vmem:[%s836_s4 + $0x68] sm:$0xff] %v438_v7 }

</bundles_post_ra>
